<compile_context>
chip_gen: v5e
topology: v5e:2x2
jax: 0.10.0
libtpu: 0.0.40
codegen_flags: <defaults>
</compile_context>

<pallas_src>
import functools

import jax
import jax.numpy as jnp
from jax.experimental import pallas as pl
from jax.experimental.pallas import tpu as pltpu


def _round_up(n, m):
    return ((n + m - 1) // m) * m


def _cdiv(a, b):
    return (a + b - 1) // b


def _fused_mlp_kernel(*refs, n_mid):
    """One batch-tile of the whole MLP.

    refs (inputs..., output):
      x_ref : (bm, P_in)            bf16  batch tile, zero-padded features
      w0_ref: (P_in, P_h)           bf16  first layer weight (pre-transposed)
      b0_ref: (1, P_h)              f32
      wm_ref: (n_mid, P_h, P_h)     bf16  middle layers (only if n_mid > 0)
      bm_ref: (n_mid, 1, P_h)       f32
      wl_ref: (P_h, P_out)          bf16  last layer weight
      bl_ref: (1, P_out)            f32
      o_ref : (bm, P_out)           f32   output tile (valid cols = Q_size)
    """
    if n_mid > 0:
        x_ref, w0_ref, b0_ref, wm_ref, bm_ref, wl_ref, bl_ref, o_ref = refs
    else:
        x_ref, w0_ref, b0_ref, wl_ref, bl_ref, o_ref = refs
        wm_ref = bm_ref = None

    cdt = w0_ref.dtype                      # compute dtype (bf16)
    act = x_ref[...]                        # bf16 running activation

    # Layer 0: q -> hidden, ReLU.
    y = jnp.dot(act, w0_ref[...], preferred_element_type=jnp.float32) + b0_ref[...]
    act = jnp.maximum(y, 0.0).astype(cdt)

    # Middle layers: hidden -> hidden, ReLU (static count -> fully unrolled).
    for i in range(n_mid):
        y = jnp.dot(act, wm_ref[i], preferred_element_type=jnp.float32) + bm_ref[i]
        act = jnp.maximum(y, 0.0).astype(cdt)

    # Last layer: hidden -> Q_size, 0.5*tanh(y)+0.5 (EUP tanh, f32).
    y = jnp.dot(act, wl_ref[...], preferred_element_type=jnp.float32) + bl_ref[...]
    o_ref[...] = (0.5 * jnp.tanh(y) + 0.5).astype(o_ref.dtype)


def prepare_decoder_params(params, *, compute_dtype=jnp.bfloat16):
    """One-time padding/stacking of the Decoder weights (hoisted out of the call path).

    params: list of (w_t, b) with w_t shape (din, dout), b shape (dout,).
    """
    layers = len(params)
    # The module's layers==1 case outputs q+Q_size dims; the fused path below
    # assumes the standard Linear->ReLU->...->Linear->tanh structure.
    assert layers >= 2, "fused Decoder kernel expects layers >= 2"
    q = params[0][0].shape[0]
    hidden = params[0][0].shape[1]
    Q_size = params[-1][0].shape[1]
    n_mid = layers - 2

    P_in = _round_up(q, 128)
    P_h = _round_up(hidden, 128)
    P_out = _round_up(Q_size, 128)

    def pad_w(w_t, pin, pout):
        din, dout = w_t.shape
        return jnp.zeros((pin, pout), compute_dtype).at[:din, :dout].set(
            w_t.astype(compute_dtype))

    def pad_b(b, pout):
        return jnp.zeros((1, pout), jnp.float32).at[0, :b.shape[0]].set(
            b.astype(jnp.float32))

    w0 = pad_w(params[0][0], P_in, P_h)
    b0 = pad_b(params[0][1], P_h)
    wl = pad_w(params[-1][0], P_h, P_out)
    bl = pad_b(params[-1][1], P_out)
    if n_mid > 0:
        wm = jnp.stack([pad_w(params[i][0], P_h, P_h) for i in range(1, layers - 1)])
        bmid = jnp.stack([pad_b(params[i][1], P_h) for i in range(1, layers - 1)])
    else:
        wm = bmid = None

    return dict(w0=w0, b0=b0, wm=wm, bm=bmid, wl=wl, bl=bl,
                q=q, hidden=hidden, Q_size=Q_size, layers=layers, n_mid=n_mid,
                P_in=P_in, P_h=P_h, P_out=P_out, compute_dtype=compute_dtype)


def _pick_batch_tile(B, P_h):
    """Rows per grid tile: big enough to amortize per-step overhead, small
    enough for v7x's 64 MiB VMEM, >=2 tiles for megacore when B is large,
    and sized so batch padding waste stays below one tile."""
    if P_h >= 2048:
        max_bm = 256
    elif P_h >= 1024:
        max_bm = 512
    else:
        max_bm = 1024
    n_tiles = max(1, _cdiv(B, max_bm))
    if B >= 256:
        n_tiles = max(n_tiles, 2)        # v7x: give both TensorCores a tile
    return _round_up(_cdiv(B, n_tiles), 8)


def decoder_forward(x, prepared):
    """Fused Decoder forward pass via a single pallas_call."""
    B, q = x.shape
    assert q == prepared["q"]
    cdt = prepared["compute_dtype"]
    P_in, P_h, P_out = prepared["P_in"], prepared["P_h"], prepared["P_out"]
    n_mid = prepared["n_mid"]
    Q_size = prepared["Q_size"]

    bm = _pick_batch_tile(B, P_h)
    B_pad = _round_up(B, bm)
    n_bt = B_pad // bm

    # Input tile in compute dtype (bf16) -> half the input DMA of f32.
    x_pad = jnp.zeros((B_pad, P_in), cdt).at[:B, :q].set(x.astype(cdt))

    operands = [x_pad, prepared["w0"], prepared["b0"]]
    if n_mid > 0:
        operands += [prepared["wm"], prepared["bm"]]
    operands += [prepared["wl"], prepared["bl"]]

    # VMEM footprint: single-buffered weights + double-buffered x/out tiles +
    # allowance for f32/bf16 intermediates; used to set vmem_limit_bytes.
    itemsz = jnp.dtype(cdt).itemsize
    w_bytes = (prepared["w0"].size + prepared["wl"].size
               + (prepared["wm"].size if n_mid > 0 else 0)) * itemsz
    b_bytes = (prepared["b0"].size + prepared["bl"].size
               + (prepared["bm"].size if n_mid > 0 else 0)) * 4
    io_bytes = 2 * bm * P_in * itemsz + 2 * bm * P_out * 4
    act_bytes = 2 * bm * P_h * (4 + itemsz)
    vmem_needed = w_bytes + b_bytes + io_bytes + act_bytes
    vmem_limit = int(min(max(vmem_needed * 13 // 10 + (1 << 20), 8 << 20), 56 << 20))

    flops = 2 * B_pad * (P_in * P_h + n_mid * P_h * P_h + P_h * P_out)
    cost = pl.CostEstimate(
        flops=flops,
        transcendentals=B_pad * P_out,
        bytes_accessed=(x_pad.size * itemsz + w_bytes + b_bytes + B_pad * P_out * 4),
    )

    def build(single_buffer_weights):
        # Grid-invariant weights/biases are fetched once; single-buffer them
        # so the largest fixed VMEM consumer is not double-buffered.
        w_kw = {"pipeline_mode": pl.Buffered(1)} if single_buffer_weights else {}

        in_specs = [
            pl.BlockSpec((bm, P_in), lambda i: (i, 0)),
            pl.BlockSpec((P_in, P_h), lambda i: (0, 0), **w_kw),
            pl.BlockSpec((1, P_h), lambda i: (0, 0), **w_kw),
        ]
        if n_mid > 0:
            in_specs += [
                pl.BlockSpec((n_mid, P_h, P_h), lambda i: (0, 0, 0), **w_kw),
                pl.BlockSpec((n_mid, 1, P_h), lambda i: (0, 0, 0), **w_kw),
            ]
        in_specs += [
            pl.BlockSpec((P_h, P_out), lambda i: (0, 0), **w_kw),
            pl.BlockSpec((1, P_out), lambda i: (0, 0), **w_kw),
        ]

        return pl.pallas_call(
            functools.partial(_fused_mlp_kernel, n_mid=n_mid),
            out_shape=jax.ShapeDtypeStruct((B_pad, P_out), jnp.float32),
            grid=(n_bt,),
            in_specs=in_specs,
            out_specs=pl.BlockSpec((bm, P_out), lambda i: (i, 0)),
            compiler_params=pltpu.CompilerParams(
                dimension_semantics=("parallel",),   # batch tiles independent
                vmem_limit_bytes=vmem_limit,
            ),
            cost_estimate=cost,
        )

    try:
        out_pad = jax.block_until_ready(build(True)(*operands))
    except Exception:
        # Conservative fallback if Buffered(1) is rejected by this compiler.
        out_pad = jax.block_until_ready(build(False)(*operands))

    # Padded rows/cols hold 0.5 after the final 0.5*tanh+0.5; slice them away.
    return out_pad[:B, :Q_size].astype(x.dtype)


def init_decoder_params(key, q, Q_size, layers, dtype=jnp.float32):
    """Deterministic init mirroring nn.Linear shapes (weights stored transposed)."""
    params = []
    hidden = q + Q_size
    for i in range(layers):
        din = q if i == 0 else hidden
        dout = hidden if i < layers - 1 else Q_size
        key, kw, kb = jax.random.split(key, 3)
        bound = 1.0 / jnp.sqrt(jnp.asarray(din, dtype))
        w_t = jax.random.uniform(kw, (din, dout), dtype, -bound, bound)
        b = jax.random.uniform(kb, (dout,), dtype, -bound, bound)
        params.append((w_t, b))
    return params


def decoder_reference(x, params, compute_dtype=None):
    """Pure-JAX reference. If compute_dtype is set, mimic the kernel's operand cast."""
    out = x.astype(jnp.float32)
    layers = len(params)
    for i, (w_t, b) in enumerate(params):
        if compute_dtype is not None:
            y = jnp.dot(out.astype(compute_dtype), w_t.astype(compute_dtype),
                        preferred_element_type=jnp.float32)
        else:
            y = jnp.dot(out, w_t.astype(jnp.float32))
        y = y + b.astype(jnp.float32)
        if i < layers - 1:
            out = jnp.maximum(y, 0.0)
        else:
            out = 0.5 * jnp.tanh(y) + 0.5
    return out


if __name__ == "__main__":
    # Small shapes consistent with the module's forward.
    batch, q, Q_size, layers = 8, 16, 32, 3

    key = jax.random.PRNGKey(0)
    kx, kp = jax.random.split(key)
    x = jax.random.normal(kx, (batch, q), jnp.float32)
    params = init_decoder_params(kp, q, Q_size, layers)

    prepared = prepare_decoder_params(params)       # one-time padding/stacking
    out = decoder_forward(x, prepared)
    out = jax.block_until_ready(out)
    assert out.shape == (batch, Q_size), out.shape

    # Tight check vs a reference using the same bf16-operand / f32-accum matmuls.
    ref_bf16 = decoder_reference(x, params, compute_dtype=jnp.bfloat16)
    assert jnp.allclose(out, ref_bf16, atol=2e-3, rtol=2e-3), "mismatch vs bf16 reference"

    # Loose check vs the exact f32 module semantics (bf16 rounding error only).
    ref_f32 = decoder_reference(x, params)
    assert jnp.allclose(out, ref_f32, atol=5e-2, rtol=5e-2), "mismatch vs f32 reference"

    print("KERNEL_OK")
</pallas_src>

<mosaic_0001>
module attributes {stable_mosaic.version = 11 : i64} {
  func.func @_fused_mlp_kernel(%arg0: i32, %arg1: memref<8x128xbf16, #tpu.memory_space<vmem>>, %arg2: memref<128x128xbf16, #tpu.memory_space<vmem>>, %arg3: memref<1x128xf32, #tpu.memory_space<vmem>>, %arg4: memref<1x128x128xbf16, #tpu.memory_space<vmem>>, %arg5: memref<1x1x128xf32, #tpu.memory_space<vmem>>, %arg6: memref<128x128xbf16, #tpu.memory_space<vmem>>, %arg7: memref<1x128xf32, #tpu.memory_space<vmem>>, %arg8: memref<8x128xf32, #tpu.memory_space<vmem>>) attributes {dimension_semantics = [#tpu.dimension_semantics<parallel>], iteration_bounds = array<i64: 1>, scalar_prefetch = 0 : i64, scratch_operands = 0 : i64, tpu.core_type = #tpu.core_type<tc>, window_params = [{transform_indices = @transform_0, window_bounds = array<i64: 8, 128>}, {pipeline_mode = #tpu.pipeline_mode<synchronous>, transform_indices = @transform_1, window_bounds = array<i64: 128, 128>}, {pipeline_mode = #tpu.pipeline_mode<synchronous>, transform_indices = @transform_2, window_bounds = array<i64: 1, 128>}, {pipeline_mode = #tpu.pipeline_mode<synchronous>, transform_indices = @transform_3, window_bounds = array<i64: 1, 128, 128>}, {pipeline_mode = #tpu.pipeline_mode<synchronous>, transform_indices = @transform_4, window_bounds = array<i64: 1, 1, 128>}, {pipeline_mode = #tpu.pipeline_mode<synchronous>, transform_indices = @transform_5, window_bounds = array<i64: 128, 128>}, {pipeline_mode = #tpu.pipeline_mode<synchronous>, transform_indices = @transform_6, window_bounds = array<i64: 1, 128>}, {transform_indices = @transform_7, window_bounds = array<i64: 8, 128>}]} {
    %c0 = arith.constant 0 : index
    %c0_0 = arith.constant 0 : index
    %0 = vector.load %arg1[%c0, %c0_0] : memref<8x128xbf16, #tpu.memory_space<vmem>>, vector<8x128xbf16>
    %c0_1 = arith.constant 0 : index
    %c0_2 = arith.constant 0 : index
    %1 = vector.load %arg2[%c0_1, %c0_2] : memref<128x128xbf16, #tpu.memory_space<vmem>>, vector<128x128xbf16>
    %cst = arith.constant dense<0.000000e+00> : vector<8x128xf32>
    %2 = tpu.matmul %0, %1, %cst {dimension_numbers = #tpu.dot_dimension_numbers<[1], [0], [0], [1], [0, 0, 1, 1], [], []>} : vector<8x128xbf16>, vector<128x128xbf16>, vector<8x128xf32> -> vector<8x128xf32>
    %c0_3 = arith.constant 0 : index
    %c0_4 = arith.constant 0 : index
    %3 = vector.load %arg3[%c0_3, %c0_4] : memref<1x128xf32, #tpu.memory_space<vmem>>, vector<1x128xf32>
    %4 = vector.broadcast %3 : vector<1x128xf32> to vector<8x128xf32>
    %5 = arith.addf %2, %4 : vector<8x128xf32>
    %cst_5 = arith.constant 0.000000e+00 : f32
    %6 = vector.broadcast %cst_5 : f32 to vector<8x128xf32>
    %7 = arith.maximumf %5, %6 : vector<8x128xf32>
    %8 = arith.truncf %7 : vector<8x128xf32> to vector<8x128xbf16>
    %c0_6 = arith.constant 0 : index
    %c0_7 = arith.constant 0 : index
    %c0_8 = arith.constant 0 : index
    %9 = vector.load %arg4[%c0_6, %c0_7, %c0_8] : memref<1x128x128xbf16, #tpu.memory_space<vmem>>, vector<1x128x128xbf16>
    %10 = vector.shape_cast %9 : vector<1x128x128xbf16> to vector<128x128xbf16>
    %cst_9 = arith.constant dense<0.000000e+00> : vector<8x128xf32>
    %11 = tpu.matmul %8, %10, %cst_9 {dimension_numbers = #tpu.dot_dimension_numbers<[1], [0], [0], [1], [0, 0, 1, 1], [], []>} : vector<8x128xbf16>, vector<128x128xbf16>, vector<8x128xf32> -> vector<8x128xf32>
    %c0_10 = arith.constant 0 : index
    %c0_11 = arith.constant 0 : index
    %c0_12 = arith.constant 0 : index
    %12 = vector.load %arg5[%c0_10, %c0_11, %c0_12] : memref<1x1x128xf32, #tpu.memory_space<vmem>>, vector<1x1x128xf32>
    %13 = vector.shape_cast %12 : vector<1x1x128xf32> to vector<1x128xf32>
    %14 = vector.broadcast %13 : vector<1x128xf32> to vector<8x128xf32>
    %15 = arith.addf %11, %14 : vector<8x128xf32>
    %cst_13 = arith.constant 0.000000e+00 : f32
    %16 = vector.broadcast %cst_13 : f32 to vector<8x128xf32>
    %17 = arith.maximumf %15, %16 : vector<8x128xf32>
    %18 = arith.truncf %17 : vector<8x128xf32> to vector<8x128xbf16>
    %c0_14 = arith.constant 0 : index
    %c0_15 = arith.constant 0 : index
    %19 = vector.load %arg6[%c0_14, %c0_15] : memref<128x128xbf16, #tpu.memory_space<vmem>>, vector<128x128xbf16>
    %cst_16 = arith.constant dense<0.000000e+00> : vector<8x128xf32>
    %20 = tpu.matmul %18, %19, %cst_16 {dimension_numbers = #tpu.dot_dimension_numbers<[1], [0], [0], [1], [0, 0, 1, 1], [], []>} : vector<8x128xbf16>, vector<128x128xbf16>, vector<8x128xf32> -> vector<8x128xf32>
    %c0_17 = arith.constant 0 : index
    %c0_18 = arith.constant 0 : index
    %21 = vector.load %arg7[%c0_17, %c0_18] : memref<1x128xf32, #tpu.memory_space<vmem>>, vector<1x128xf32>
    %22 = vector.broadcast %21 : vector<1x128xf32> to vector<8x128xf32>
    %23 = arith.addf %20, %22 : vector<8x128xf32>
    %24 = math.tanh %23 : vector<8x128xf32>
    %cst_19 = arith.constant 5.000000e-01 : f32
    %25 = vector.broadcast %cst_19 : f32 to vector<8x128xf32>
    %26 = arith.mulf %25, %24 : vector<8x128xf32>
    %cst_20 = arith.constant 5.000000e-01 : f32
    %27 = vector.broadcast %cst_20 : f32 to vector<8x128xf32>
    %28 = arith.addf %26, %27 : vector<8x128xf32>
    %c0_21 = arith.constant 0 : index
    %c0_22 = arith.constant 0 : index
    %29 = vector.load %arg8[%c0_21, %c0_22] : memref<8x128xf32, #tpu.memory_space<vmem>>, vector<8x128xf32>
    tpu.vector_store %arg8[%c0_21, %c0_22], %28 {strides = array<i32>} : memref<8x128xf32, #tpu.memory_space<vmem>>, vector<8x128xf32>,
    return
  }
  func.func @transform_0(%arg0: i32) -> (i32, i32) {
    %c0_i32 = arith.constant 0 : i32
    %c0_i32_0 = arith.constant 0 : i32
    return %arg0, %c0_i32 : i32, i32
  }
  func.func @transform_1(%arg0: i32) -> (i32, i32) {
    %c0_i32 = arith.constant 0 : i32
    %c0_i32_0 = arith.constant 0 : i32
    %c0_i32_1 = arith.constant 0 : i32
    return %c0_i32, %c0_i32_0 : i32, i32
  }
  func.func @transform_2(%arg0: i32) -> (i32, i32) {
    %c0_i32 = arith.constant 0 : i32
    %c0_i32_0 = arith.constant 0 : i32
    %c0_i32_1 = arith.constant 0 : i32
    return %c0_i32, %c0_i32_0 : i32, i32
  }
  func.func @transform_3(%arg0: i32) -> (i32, i32, i32) {
    %c0_i32 = arith.constant 0 : i32
    %c0_i32_0 = arith.constant 0 : i32
    %c0_i32_1 = arith.constant 0 : i32
    %c0_i32_2 = arith.constant 0 : i32
    return %c0_i32, %c0_i32_0, %c0_i32_1 : i32, i32, i32
  }
  func.func @transform_4(%arg0: i32) -> (i32, i32, i32) {
    %c0_i32 = arith.constant 0 : i32
    %c0_i32_0 = arith.constant 0 : i32
    %c0_i32_1 = arith.constant 0 : i32
    %c0_i32_2 = arith.constant 0 : i32
    return %c0_i32, %c0_i32_0, %c0_i32_1 : i32, i32, i32
  }
  func.func @transform_5(%arg0: i32) -> (i32, i32) {
    %c0_i32 = arith.constant 0 : i32
    %c0_i32_0 = arith.constant 0 : i32
    %c0_i32_1 = arith.constant 0 : i32
    return %c0_i32, %c0_i32_0 : i32, i32
  }
  func.func @transform_6(%arg0: i32) -> (i32, i32) {
    %c0_i32 = arith.constant 0 : i32
    %c0_i32_0 = arith.constant 0 : i32
    %c0_i32_1 = arith.constant 0 : i32
    return %c0_i32, %c0_i32_0 : i32, i32
  }
  func.func @transform_7(%arg0: i32) -> (i32, i32) {
    %c0_i32 = arith.constant 0 : i32
    %c0_i32_0 = arith.constant 0 : i32
    return %arg0, %c0_i32 : i32, i32
  }
}

module attributes {stable_mosaic.version = 11 : i64} {
  func.func @_fused_mlp_kernel(%arg0: i32, %arg1: memref<8x128xbf16, #tpu.memory_space<vmem>>, %arg2: memref<128x128xbf16, #tpu.memory_space<vmem>>, %arg3: memref<1x128xf32, #tpu.memory_space<vmem>>, %arg4: memref<1x128x128xbf16, #tpu.memory_space<vmem>>, %arg5: memref<1x1x128xf32, #tpu.memory_space<vmem>>, %arg6: memref<128x128xbf16, #tpu.memory_space<vmem>>, %arg7: memref<1x128xf32, #tpu.memory_space<vmem>>, %arg8: memref<8x128xf32, #tpu.memory_space<vmem>>) attributes {dimension_semantics = [#tpu.dimension_semantics<parallel>], iteration_bounds = array<i64: 1>, scalar_prefetch = 0 : i64, scratch_operands = 0 : i64, tpu.core_type = #tpu.core_type<tc>, window_params = [{transform_indices = @transform_0, window_bounds = array<i64: 8, 128>}, {pipeline_mode = #tpu.pipeline_mode<synchronous>, transform_indices = @transform_1, window_bounds = array<i64: 128, 128>}, {pipeline_mode = #tpu.pipeline_mode<synchronous>, transform_indices = @transform_2, window_bounds = array<i64: 1, 128>}, {pipeline_mode = #tpu.pipeline_mode<synchronous>, transform_indices = @transform_3, window_bounds = array<i64: 1, 128, 128>}, {pipeline_mode = #tpu.pipeline_mode<synchronous>, transform_indices = @transform_4, window_bounds = array<i64: 1, 1, 128>}, {pipeline_mode = #tpu.pipeline_mode<synchronous>, transform_indices = @transform_5, window_bounds = array<i64: 128, 128>}, {pipeline_mode = #tpu.pipeline_mode<synchronous>, transform_indices = @transform_6, window_bounds = array<i64: 1, 128>}, {transform_indices = @transform_7, window_bounds = array<i64: 8, 128>}]} {
    %c0 = arith.constant 0 : index
    %c0_0 = arith.constant 0 : index
    %0 = vector.load %arg1[%c0, %c0_0] : memref<8x128xbf16, #tpu.memory_space<vmem>>, vector<8x128xbf16>
    %c0_1 = arith.constant 0 : index
    %c0_2 = arith.constant 0 : index
    %1 = vector.load %arg2[%c0_1, %c0_2] : memref<128x128xbf16, #tpu.memory_space<vmem>>, vector<128x128xbf16>
    %cst = arith.constant dense<0.000000e+00> : vector<8x128xf32>
    %2 = tpu.matmul %0, %1, %cst {dimension_numbers = #tpu.dot_dimension_numbers<[1], [0], [0], [1], [0, 0, 1, 1], [], []>} : vector<8x128xbf16>, vector<128x128xbf16>, vector<8x128xf32> -> vector<8x128xf32>
    %c0_3 = arith.constant 0 : index
    %c0_4 = arith.constant 0 : index
    %3 = vector.load %arg3[%c0_3, %c0_4] : memref<1x128xf32, #tpu.memory_space<vmem>>, vector<1x128xf32>
    %4 = vector.broadcast %3 : vector<1x128xf32> to vector<8x128xf32>
    %5 = arith.addf %2, %4 : vector<8x128xf32>
    %cst_5 = arith.constant 0.000000e+00 : f32
    %6 = vector.broadcast %cst_5 : f32 to vector<8x128xf32>
    %7 = arith.maximumf %5, %6 : vector<8x128xf32>
    %8 = arith.truncf %7 : vector<8x128xf32> to vector<8x128xbf16>
    %c0_6 = arith.constant 0 : index
    %c0_7 = arith.constant 0 : index
    %c0_8 = arith.constant 0 : index
    %9 = vector.load %arg4[%c0_6, %c0_7, %c0_8] : memref<1x128x128xbf16, #tpu.memory_space<vmem>>, vector<1x128x128xbf16>
    %10 = vector.shape_cast %9 : vector<1x128x128xbf16> to vector<128x128xbf16>
    %cst_9 = arith.constant dense<0.000000e+00> : vector<8x128xf32>
    %11 = tpu.matmul %8, %10, %cst_9 {dimension_numbers = #tpu.dot_dimension_numbers<[1], [0], [0], [1], [0, 0, 1, 1], [], []>} : vector<8x128xbf16>, vector<128x128xbf16>, vector<8x128xf32> -> vector<8x128xf32>
    %c0_10 = arith.constant 0 : index
    %c0_11 = arith.constant 0 : index
    %c0_12 = arith.constant 0 : index
    %12 = vector.load %arg5[%c0_10, %c0_11, %c0_12] : memref<1x1x128xf32, #tpu.memory_space<vmem>>, vector<1x1x128xf32>
    %13 = vector.shape_cast %12 : vector<1x1x128xf32> to vector<1x128xf32>
    %14 = vector.broadcast %13 : vector<1x128xf32> to vector<8x128xf32>
    %15 = arith.addf %11, %14 : vector<8x128xf32>
    %cst_13 = arith.constant 0.000000e+00 : f32
    %16 = vector.broadcast %cst_13 : f32 to vector<8x128xf32>
    %17 = arith.maximumf %15, %16 : vector<8x128xf32>
    %18 = arith.truncf %17 : vector<8x128xf32> to vector<8x128xbf16>
    %c0_14 = arith.constant 0 : index
    %c0_15 = arith.constant 0 : index
    %19 = vector.load %arg6[%c0_14, %c0_15] : memref<128x128xbf16, #tpu.memory_space<vmem>>, vector<128x128xbf16>
    %cst_16 = arith.constant dense<0.000000e+00> : vector<8x128xf32>
    %20 = tpu.matmul %18, %19, %cst_16 {dimension_numbers = #tpu.dot_dimension_numbers<[1], [0], [0], [1], [0, 0, 1, 1], [], []>} : vector<8x128xbf16>, vector<128x128xbf16>, vector<8x128xf32> -> vector<8x128xf32>
    %c0_17 = arith.constant 0 : index
    %c0_18 = arith.constant 0 : index
    %21 = vector.load %arg7[%c0_17, %c0_18] : memref<1x128xf32, #tpu.memory_space<vmem>>, vector<1x128xf32>
    %22 = vector.broadcast %21 : vector<1x128xf32> to vector<8x128xf32>
    %23 = arith.addf %20, %22 : vector<8x128xf32>
    %24 = math.tanh %23 : vector<8x128xf32>
    %cst_19 = arith.constant 5.000000e-01 : f32
    %25 = vector.broadcast %cst_19 : f32 to vector<8x128xf32>
    %26 = arith.mulf %25, %24 : vector<8x128xf32>
    %cst_20 = arith.constant 5.000000e-01 : f32
    %27 = vector.broadcast %cst_20 : f32 to vector<8x128xf32>
    %28 = arith.addf %26, %27 : vector<8x128xf32>
    %c0_21 = arith.constant 0 : index
    %c0_22 = arith.constant 0 : index
    %29 = vector.load %arg8[%c0_21, %c0_22] : memref<8x128xf32, #tpu.memory_space<vmem>>, vector<8x128xf32>
    tpu.vector_store %arg8[%c0_21, %c0_22], %28 {strides = array<i32>} : memref<8x128xf32, #tpu.memory_space<vmem>>, vector<8x128xf32>,
    return
  }
  func.func @transform_0(%arg0: i32) -> (i32, i32) {
    %c0_i32 = arith.constant 0 : i32
    %c0_i32_0 = arith.constant 0 : i32
    return %arg0, %c0_i32 : i32, i32
  }
  func.func @transform_1(%arg0: i32) -> (i32, i32) {
    %c0_i32 = arith.constant 0 : i32
    %c0_i32_0 = arith.constant 0 : i32
    %c0_i32_1 = arith.constant 0 : i32
    return %c0_i32, %c0_i32_0 : i32, i32
  }
  func.func @transform_2(%arg0: i32) -> (i32, i32) {
    %c0_i32 = arith.constant 0 : i32
    %c0_i32_0 = arith.constant 0 : i32
    %c0_i32_1 = arith.constant 0 : i32
    return %c0_i32, %c0_i32_0 : i32, i32
  }
  func.func @transform_3(%arg0: i32) -> (i32, i32, i32) {
    %c0_i32 = arith.constant 0 : i32
    %c0_i32_0 = arith.constant 0 : i32
    %c0_i32_1 = arith.constant 0 : i32
    %c0_i32_2 = arith.constant 0 : i32
    return %c0_i32, %c0_i32_0, %c0_i32_1 : i32, i32, i32
  }
  func.func @transform_4(%arg0: i32) -> (i32, i32, i32) {
    %c0_i32 = arith.constant 0 : i32
    %c0_i32_0 = arith.constant 0 : i32
    %c0_i32_1 = arith.constant 0 : i32
    %c0_i32_2 = arith.constant 0 : i32
    return %c0_i32, %c0_i32_0, %c0_i32_1 : i32, i32, i32
  }
  func.func @transform_5(%arg0: i32) -> (i32, i32) {
    %c0_i32 = arith.constant 0 : i32
    %c0_i32_0 = arith.constant 0 : i32
    %c0_i32_1 = arith.constant 0 : i32
    return %c0_i32, %c0_i32_0 : i32, i32
  }
  func.func @transform_6(%arg0: i32) -> (i32, i32) {
    %c0_i32 = arith.constant 0 : i32
    %c0_i32_0 = arith.constant 0 : i32
    %c0_i32_1 = arith.constant 0 : i32
    return %c0_i32, %c0_i32_0 : i32, i32
  }
  func.func @transform_7(%arg0: i32) -> (i32, i32) {
    %c0_i32 = arith.constant 0 : i32
    %c0_i32_0 = arith.constant 0 : i32
    return %arg0, %c0_i32 : i32, i32
  }
}

</mosaic_0001>

<bundles_post_ra>
// kernel: tpu_custom_call.1
= control target key start
LH: loop header
LB: loop body
LE: loop exit
PB: predicated region body
PF: predicated region fallthrough
CT: control target
= control target key end

     0   :  { %12 = vsyncpa [#allocation3], 0  ;;  %s690_s0 = inlined_call_operand.hbm [shape: bf16[8,128], index: 0, kind: input, shape index: {}]   ;;  %s691_s1 = inlined_call_operand.hbm [shape: bf16[128,128], index: 1, kind: input, shape index: {}]   ;;  %s692_s2 = inlined_call_operand.vmem [shape: f32[1,128], index: 2, kind: input, shape index: {}]   ;;  %s693_s3 = inlined_call_operand.hbm [shape: bf16[1,128,128], index: 3, kind: input, shape index: {}]   ;;  %s694_s4 = inlined_call_operand.vmem [shape: f32[1,1,128], index: 4, kind: input, shape index: {}]   ;;  %s695_s5 = inlined_call_operand.hbm [shape: bf16[128,128], index: 5, kind: input, shape index: {}]   ;;  %s696_s6 = inlined_call_operand.vmem [shape: f32[1,128], index: 6, kind: input, shape index: {}]   ;;  %s697_s7 = inlined_call_operand.hbm [shape: f32[8,128], index: 7, kind: output, shape index: {}]  }
   0x1   :  { %13 = vsyncpa [#allocation6], 0 }
   0x2   :  { %14 = vsyncpa [#allocation9], 0  ;;  %s31_s26 = sshll.u32 %s691_s1, 4  ;;  %s32_s26 = int_to_ptr.hbm [resolvable:$true] %s31_s26 }
   0x3   :  { %15 = vsyncpa [#allocation4], 0  ;;  %s619_s27 = smov [#allocation5]   ;;  %s21_s8 = sshll.u32 %s690_s0, 4  ;;  %s22_s8 = int_to_ptr.hbm [resolvable:$true] %s21_s8 }
   0x4   :  { %s33_s28 = sshll.u32 %s619_s27, 4  ;;  %s620_s9 = smov 64   ;;  %s34_s28 = int_to_ptr.vmem [resolvable:$true] %s33_s28 }
   0x5   :  { %s621_s10 = smov 4   ;;  %s622_s11 = smov [#allocation2]  }
   0x6   :  { %39 = dma.hbm_to_vmem [thread:$0]  %s32_s26, 1024, %s34_s28, [#allocation6], %s620_s9, %s620_s9, %s621_s10  }
   0x7   :  { %s23_s12 = sshll.u32 %s622_s11, 4  ;;  %s46_s15 = sshll.u32 %s693_s3, 4  ;;  %s24_s12 = int_to_ptr.vmem [resolvable:$true] %s23_s12  ;;  %s47_s15 = int_to_ptr.hbm [resolvable:$true] %s46_s15 }
   0x8   :  { %26 = dma.hbm_to_vmem [thread:$0]  %s22_s8, 64, %s24_s12, [#allocation3]  }
   0x9   :  { %s61_s17 = sshll.u32 %s695_s5, 4  ;;  %s623_s18 = smov [#allocation7]   ;;  %s62_s17 = int_to_ptr.hbm [resolvable:$true] %s61_s17 }
   0xa   :  { %s48_s19 = sshll.u32 %s623_s18, 4  ;;  %s624_s0 = smov [#allocation8]   ;;  %s49_s19 = int_to_ptr.vmem [resolvable:$true] %s48_s19 }
   0xb   :  { %54 = dma.hbm_to_vmem [thread:$0]  %s47_s15, 1024, %s49_s19, [#allocation6], %s620_s9, %s620_s9, %s621_s10  }
   0xc   :  { %s63_s20 = sshll.u32 %s624_s0, 4  ;;  %s64_s20 = int_to_ptr.vmem [resolvable:$true] %s63_s20 }
   0xd   :  { %69 = dma.hbm_to_vmem [thread:$0]  %s62_s17, 1024, %s64_s20, [#allocation9], %s620_s9, %s620_s9, %s621_s10  }
   0xe   :  { %611 = dma.done.wait [#allocation3], 64  }
   0xf   :  { %612 = vsyncadd [#allocation3], 4294967232 }
  0x10   :  { %613 = dma.done.wait [#allocation6], 2048  }
  0x11   :  { %614 = vsyncadd [#allocation6], 4294965248 }
  0x12   :  { %615 = dma.done.wait [#allocation9], 1024  }
  0x13   :  { %616 = vsyncadd [#allocation9], 4294966272  ;;  %v462_v0 = vld [vmem:[#allocation5 + $0x38] sm:$0xff]  ;;  %v461_v1 = vld [vmem:[#allocation5 + $0x30] sm:$0xff]  ;;  %s625_s24 = smov [#allocation10]  }
  0x14   :  { %157 = vmatpush.bf16.msra.mxu0 %v462_v0  ;;  %v470_v2 = vld [vmem:[#allocation7 + $0x38] sm:$0xff]  ;;  %v469_v3 = vld [vmem:[#allocation7 + $0x30] sm:$0xff]  ;;  %v460_v4 = vld [vmem:[#allocation5 + $0x28] sm:$0xff]  ;;  %s345_s25 = sshll.u32 %s625_s24, 4  ;;  %s346_s25 = int_to_ptr.vmem [resolvable:$true] %s345_s25 }
  0x15   :  { %240 = vmatpush.bf16.msra.mxu1 %v470_v2  ;;  %v468_v5 = vld [vmem:[#allocation7 + $0x28] sm:$0xff]  ;;  %v459_v6 = vld [vmem:[#allocation5 + $0x20] sm:$0xff]  ;;  %v458_v8 = vld [vmem:[#allocation5 + $0x18] sm:$0xff] }
  0x16   :  { %v467_v7 = vld [vmem:[#allocation7 + $0x20] sm:$0xff]  ;;  %v466_v9 = vld [vmem:[#allocation7 + $0x18] sm:$0xff]  ;;  %v457_v10 = vld [vmem:[#allocation5 + $0x10] sm:$0xff] }
  0x17   :  { %v465_v11 = vld [vmem:[#allocation7 + $0x10] sm:$0xff]  ;;  %v456_v12 = vld [vmem:[#allocation5 + $0x8] sm:$0xff]  ;;  %v455_v13 = vld [vmem:[#allocation5] sm:$0xff] }
  0x18   :  { %158 = vmatpush.bf16.msra.mxu0 %v461_v1  ;;  %v88_v14 = vld [vmem:[#allocation2] sm:$0xf]  ;;  %v464_v15 = vld [vmem:[#allocation7 + $0x8] sm:$0xff]  ;;  %v463_v16 = vld [vmem:[#allocation7] sm:$0xff] }
  0x19   :  { %241 = vmatpush.bf16.msra.mxu1 %v469_v3  ;;  %v478_v17 = vld [vmem:[#allocation8 + $0x38] sm:$0xff]  ;;  %v477_v18 = vld [vmem:[#allocation8 + $0x30] sm:$0xff]  ;;  %v476_v19 = vld [vmem:[#allocation8 + $0x28] sm:$0xff] }
  0x1a   :  { %323 = vmatpush.bf16.msra.mxu2 %v478_v17  ;;  %v475_v20 = vld [vmem:[#allocation8 + $0x20] sm:$0xff]  ;;  %v474_v21 = vld [vmem:[#allocation8 + $0x18] sm:$0xff]  ;;  %v473_v22 = vld [vmem:[#allocation8 + $0x10] sm:$0xff] }
  0x1b   :  { %v486_v23 = vld [vmem:[%s692_s2] ss:$0 sm:$0xff]  ;;  %v472_v29 = vld [vmem:[#allocation8 + $0x8] sm:$0xff]  ;;  %v471_v30 = vld [vmem:[#allocation8] sm:$0xff] }
  0x1c   :  { %159 = vmatpush.bf16.msra.mxu0 %v460_v4  ;;  %v487_v31 = vld [vmem:[%s694_s4] ss:$0 sm:$0xff]  ;;  %s347_s4 = sshll.u32 %s697_s7, 4  ;;  %s348_s4 = int_to_ptr.hbm [resolvable:$true] %s347_s4 }
  0x1d   :  { %242 = vmatpush.bf16.msra.mxu1 %v468_v5  ;;  %v488_v37 = vld [vmem:[%s696_s6] ss:$0 sm:$0xff] }
  0x1e   :  { %324 = vmatpush.bf16.msra.mxu2 %v477_v18 }
  0x20   :  { %160 = vmatpush.bf16.msra.mxu0 %v459_v6 }
  0x21   :  { %243 = vmatpush.bf16.msra.mxu1 %v467_v7 }
  0x22   :  { %325 = vmatpush.bf16.msra.mxu2 %v476_v19 }
  0x24   :  { %161 = vmatpush.bf16.msra.mxu0 %v458_v8 }
  0x25   :  { %244 = vmatpush.bf16.msra.mxu1 %v466_v9 }
  0x26   :  { %326 = vmatpush.bf16.msra.mxu2 %v475_v20 }
  0x28   :  { %162 = vmatpush.bf16.msra.mxu0 %v457_v10 }
  0x29   :  { %245 = vmatpush.bf16.msra.mxu1 %v465_v11 }
  0x2a   :  { %327 = vmatpush.bf16.msra.mxu2 %v474_v21 }
  0x2c   :  { %163 = vmatpush.bf16.msra.mxu0 %v456_v12 }
  0x2d   :  { %246 = vmatpush.bf16.msra.mxu1 %v464_v15 }
  0x2e   :  { %328 = vmatpush.bf16.msra.mxu2 %v473_v22 }
  0x30   :  { %164 = vmatpush.bf16.msra.mxu0 %v455_v13 }
  0x31   :  { %247 = vmatpush.bf16.msra.mxu1 %v463_v16 }
  0x32   :  { %329 = vmatpush.bf16.msra.mxu2 %v472_v29 }
  0x33   :  { %165 = vmatmul.bf16.vlgmr.msra.gmra.mxu0 %v88_v14 }
  0x36   :  { %330 = vmatpush.bf16.msra.mxu2 %v471_v30 }
  0xb0   :  { %v166_v24 = vpop.f32.mrf.mxu0 }
  0xb1   :  { %v167_v25 = vadd.f32 %v486_v23, %v166_v24 }
  0xb3   :  { %v170_v26 = vmax.f32 %v167_v25, 0.0 }
  0xb5   :  { %v171_v27 = vpack.c.bf16 %v170_v26, %v170_v26 }
  0xb7   :  { %248 = vmatmul.bf16.vlgmr.msra.gmra.mxu1 %v171_v27 }
  0xb8   :  { %v168_v28 = vpop.f32.mrf.mxu0 }
 0x134   :  { %v249_v32 = vpop.f32.mrf.mxu1 }
 0x135   :  { %v250_v33 = vadd.f32 %v487_v31, %v249_v32 }
 0x137   :  { %v253_v34 = vmax.f32 %v250_v33, 0.0 }
 0x139   :  { %v254_v35 = vpack.c.bf16 %v253_v34, %v253_v34 }
 0x13b   :  { %331 = vmatmul.bf16.vlgmr.msra.gmra.mxu2 %v254_v35 }
 0x13c   :  { %v251_v36 = vpop.f32.mrf.mxu1 }
 0x1be   :  { %v332_v38 = vpop.f32.mrf.mxu2 }
 0x1bf   :  { %v333_v39 = vadd.f32 %v488_v37, %v332_v38 }
 0x1c1   :  { %489 = vtanh.f32 %v333_v39 }
 0x1c6   :  { %v334_v40 = vpop.f32.mrf.mxu2 }
 0x1c7   :  { %v490_v41 = vpop.eup %489 }
 0x1c8   :  { %v337_v42 = vmul.f32 0.5, %v490_v41 }
 0x1ca   :  { %v338_v43 = vadd.f32 0.5, %v337_v42 }
 0x1cc   :  { %339 = vst [vmem:[#allocation10] sm:$0xff] %v338_v43 }
 0x1cd   :  { %350 = dma.vmem_to_hbm [thread:$0]  %s346_s25, 128, %s348_s4, [#allocation4]  }
 0x1ce   :  { %617 = dma.done.wait [#allocation4], 128  }
 0x1cf   :  { %618 = vsyncadd [#allocation4], 4294967168 }
 0x1d0   :  { %355 = vsyncpa [#allocation3], 1 }
 0x1d1   :  { %356 = vsyncpa [#allocation6], 1 }
 0x1d2   :  { %357 = vsyncpa [#allocation9], 1 }
 0x1d3   :  { %358 = vsyncpa [#allocation4], 1 }

// kernel: tpu_custom_call.1
= control target key start
LH: loop header
LB: loop body
LE: loop exit
PB: predicated region body
PF: predicated region fallthrough
CT: control target
= control target key end

     0   :  { %12 = vsyncpa [#allocation3], 0  ;;  %s690_s0 = inlined_call_operand.hbm [shape: bf16[8,128], index: 0, kind: input, shape index: {}]   ;;  %s691_s1 = inlined_call_operand.hbm [shape: bf16[128,128], index: 1, kind: input, shape index: {}]   ;;  %s692_s2 = inlined_call_operand.vmem [shape: f32[1,128], index: 2, kind: input, shape index: {}]   ;;  %s693_s3 = inlined_call_operand.hbm [shape: bf16[1,128,128], index: 3, kind: input, shape index: {}]   ;;  %s694_s4 = inlined_call_operand.vmem [shape: f32[1,1,128], index: 4, kind: input, shape index: {}]   ;;  %s695_s5 = inlined_call_operand.hbm [shape: bf16[128,128], index: 5, kind: input, shape index: {}]   ;;  %s696_s6 = inlined_call_operand.vmem [shape: f32[1,128], index: 6, kind: input, shape index: {}]   ;;  %s697_s7 = inlined_call_operand.hbm [shape: f32[8,128], index: 7, kind: output, shape index: {}]  }
   0x1   :  { %13 = vsyncpa [#allocation6], 0 }
   0x2   :  { %14 = vsyncpa [#allocation9], 0  ;;  %s31_s26 = sshll.u32 %s691_s1, 4  ;;  %s32_s26 = int_to_ptr.hbm [resolvable:$true] %s31_s26 }
   0x3   :  { %15 = vsyncpa [#allocation4], 0  ;;  %s619_s27 = smov [#allocation5]   ;;  %s21_s8 = sshll.u32 %s690_s0, 4  ;;  %s22_s8 = int_to_ptr.hbm [resolvable:$true] %s21_s8 }
   0x4   :  { %s33_s28 = sshll.u32 %s619_s27, 4  ;;  %s620_s9 = smov 64   ;;  %s34_s28 = int_to_ptr.vmem [resolvable:$true] %s33_s28 }
   0x5   :  { %s621_s10 = smov 4   ;;  %s622_s11 = smov [#allocation2]  }
   0x6   :  { %39 = dma.hbm_to_vmem [thread:$0]  %s32_s26, 1024, %s34_s28, [#allocation6], %s620_s9, %s620_s9, %s621_s10  }
   0x7   :  { %s23_s12 = sshll.u32 %s622_s11, 4  ;;  %s46_s15 = sshll.u32 %s693_s3, 4  ;;  %s24_s12 = int_to_ptr.vmem [resolvable:$true] %s23_s12  ;;  %s47_s15 = int_to_ptr.hbm [resolvable:$true] %s46_s15 }
   0x8   :  { %26 = dma.hbm_to_vmem [thread:$0]  %s22_s8, 64, %s24_s12, [#allocation3]  }
   0x9   :  { %s61_s17 = sshll.u32 %s695_s5, 4  ;;  %s623_s18 = smov [#allocation7]   ;;  %s62_s17 = int_to_ptr.hbm [resolvable:$true] %s61_s17 }
   0xa   :  { %s48_s19 = sshll.u32 %s623_s18, 4  ;;  %s624_s0 = smov [#allocation8]   ;;  %s49_s19 = int_to_ptr.vmem [resolvable:$true] %s48_s19 }
   0xb   :  { %54 = dma.hbm_to_vmem [thread:$0]  %s47_s15, 1024, %s49_s19, [#allocation6], %s620_s9, %s620_s9, %s621_s10  }
   0xc   :  { %s63_s20 = sshll.u32 %s624_s0, 4  ;;  %s64_s20 = int_to_ptr.vmem [resolvable:$true] %s63_s20 }
   0xd   :  { %69 = dma.hbm_to_vmem [thread:$0]  %s62_s17, 1024, %s64_s20, [#allocation9], %s620_s9, %s620_s9, %s621_s10  }
   0xe   :  { %611 = dma.done.wait [#allocation3], 64  }
   0xf   :  { %612 = vsyncadd [#allocation3], 4294967232 }
  0x10   :  { %613 = dma.done.wait [#allocation6], 2048  }
  0x11   :  { %614 = vsyncadd [#allocation6], 4294965248 }
  0x12   :  { %615 = dma.done.wait [#allocation9], 1024  }
  0x13   :  { %616 = vsyncadd [#allocation9], 4294966272  ;;  %v462_v0 = vld [vmem:[#allocation5 + $0x38] sm:$0xff]  ;;  %v461_v1 = vld [vmem:[#allocation5 + $0x30] sm:$0xff]  ;;  %s625_s24 = smov [#allocation10]  }
  0x14   :  { %157 = vmatpush.bf16.msra.mxu0 %v462_v0  ;;  %v470_v2 = vld [vmem:[#allocation7 + $0x38] sm:$0xff]  ;;  %v469_v3 = vld [vmem:[#allocation7 + $0x30] sm:$0xff]  ;;  %v460_v4 = vld [vmem:[#allocation5 + $0x28] sm:$0xff]  ;;  %s345_s25 = sshll.u32 %s625_s24, 4  ;;  %s346_s25 = int_to_ptr.vmem [resolvable:$true] %s345_s25 }
  0x15   :  { %240 = vmatpush.bf16.msra.mxu1 %v470_v2  ;;  %v468_v5 = vld [vmem:[#allocation7 + $0x28] sm:$0xff]  ;;  %v459_v6 = vld [vmem:[#allocation5 + $0x20] sm:$0xff]  ;;  %v458_v8 = vld [vmem:[#allocation5 + $0x18] sm:$0xff] }
  0x16   :  { %v467_v7 = vld [vmem:[#allocation7 + $0x20] sm:$0xff]  ;;  %v466_v9 = vld [vmem:[#allocation7 + $0x18] sm:$0xff]  ;;  %v457_v10 = vld [vmem:[#allocation5 + $0x10] sm:$0xff] }
  0x17   :  { %v465_v11 = vld [vmem:[#allocation7 + $0x10] sm:$0xff]  ;;  %v456_v12 = vld [vmem:[#allocation5 + $0x8] sm:$0xff]  ;;  %v455_v13 = vld [vmem:[#allocation5] sm:$0xff] }
  0x18   :  { %158 = vmatpush.bf16.msra.mxu0 %v461_v1  ;;  %v88_v14 = vld [vmem:[#allocation2] sm:$0xf]  ;;  %v464_v15 = vld [vmem:[#allocation7 + $0x8] sm:$0xff]  ;;  %v463_v16 = vld [vmem:[#allocation7] sm:$0xff] }
  0x19   :  { %241 = vmatpush.bf16.msra.mxu1 %v469_v3  ;;  %v478_v17 = vld [vmem:[#allocation8 + $0x38] sm:$0xff]  ;;  %v477_v18 = vld [vmem:[#allocation8 + $0x30] sm:$0xff]  ;;  %v476_v19 = vld [vmem:[#allocation8 + $0x28] sm:$0xff] }
  0x1a   :  { %323 = vmatpush.bf16.msra.mxu2 %v478_v17  ;;  %v475_v20 = vld [vmem:[#allocation8 + $0x20] sm:$0xff]  ;;  %v474_v21 = vld [vmem:[#allocation8 + $0x18] sm:$0xff]  ;;  %v473_v22 = vld [vmem:[#allocation8 + $0x10] sm:$0xff] }
  0x1b   :  { %v486_v23 = vld [vmem:[%s692_s2] ss:$0 sm:$0xff]  ;;  %v472_v29 = vld [vmem:[#allocation8 + $0x8] sm:$0xff]  ;;  %v471_v30 = vld [vmem:[#allocation8] sm:$0xff] }
  0x1c   :  { %159 = vmatpush.bf16.msra.mxu0 %v460_v4  ;;  %v487_v31 = vld [vmem:[%s694_s4] ss:$0 sm:$0xff]  ;;  %s347_s4 = sshll.u32 %s697_s7, 4  ;;  %s348_s4 = int_to_ptr.hbm [resolvable:$true] %s347_s4 }
  0x1d   :  { %242 = vmatpush.bf16.msra.mxu1 %v468_v5  ;;  %v488_v37 = vld [vmem:[%s696_s6] ss:$0 sm:$0xff] }
  0x1e   :  { %324 = vmatpush.bf16.msra.mxu2 %v477_v18 }
  0x20   :  { %160 = vmatpush.bf16.msra.mxu0 %v459_v6 }
  0x21   :  { %243 = vmatpush.bf16.msra.mxu1 %v467_v7 }
  0x22   :  { %325 = vmatpush.bf16.msra.mxu2 %v476_v19 }
  0x24   :  { %161 = vmatpush.bf16.msra.mxu0 %v458_v8 }
  0x25   :  { %244 = vmatpush.bf16.msra.mxu1 %v466_v9 }
  0x26   :  { %326 = vmatpush.bf16.msra.mxu2 %v475_v20 }
  0x28   :  { %162 = vmatpush.bf16.msra.mxu0 %v457_v10 }
  0x29   :  { %245 = vmatpush.bf16.msra.mxu1 %v465_v11 }
  0x2a   :  { %327 = vmatpush.bf16.msra.mxu2 %v474_v21 }
  0x2c   :  { %163 = vmatpush.bf16.msra.mxu0 %v456_v12 }
  0x2d   :  { %246 = vmatpush.bf16.msra.mxu1 %v464_v15 }
  0x2e   :  { %328 = vmatpush.bf16.msra.mxu2 %v473_v22 }
  0x30   :  { %164 = vmatpush.bf16.msra.mxu0 %v455_v13 }
  0x31   :  { %247 = vmatpush.bf16.msra.mxu1 %v463_v16 }
  0x32   :  { %329 = vmatpush.bf16.msra.mxu2 %v472_v29 }
  0x33   :  { %165 = vmatmul.bf16.vlgmr.msra.gmra.mxu0 %v88_v14 }
  0x36   :  { %330 = vmatpush.bf16.msra.mxu2 %v471_v30 }
  0xb0   :  { %v166_v24 = vpop.f32.mrf.mxu0 }
  0xb1   :  { %v167_v25 = vadd.f32 %v486_v23, %v166_v24 }
  0xb3   :  { %v170_v26 = vmax.f32 %v167_v25, 0.0 }
  0xb5   :  { %v171_v27 = vpack.c.bf16 %v170_v26, %v170_v26 }
  0xb7   :  { %248 = vmatmul.bf16.vlgmr.msra.gmra.mxu1 %v171_v27 }
  0xb8   :  { %v168_v28 = vpop.f32.mrf.mxu0 }
 0x134   :  { %v249_v32 = vpop.f32.mrf.mxu1 }
 0x135   :  { %v250_v33 = vadd.f32 %v487_v31, %v249_v32 }
 0x137   :  { %v253_v34 = vmax.f32 %v250_v33, 0.0 }
 0x139   :  { %v254_v35 = vpack.c.bf16 %v253_v34, %v253_v34 }
 0x13b   :  { %331 = vmatmul.bf16.vlgmr.msra.gmra.mxu2 %v254_v35 }
 0x13c   :  { %v251_v36 = vpop.f32.mrf.mxu1 }
 0x1be   :  { %v332_v38 = vpop.f32.mrf.mxu2 }
 0x1bf   :  { %v333_v39 = vadd.f32 %v488_v37, %v332_v38 }
 0x1c1   :  { %489 = vtanh.f32 %v333_v39 }
 0x1c6   :  { %v334_v40 = vpop.f32.mrf.mxu2 }
 0x1c7   :  { %v490_v41 = vpop.eup %489 }
 0x1c8   :  { %v337_v42 = vmul.f32 0.5, %v490_v41 }
 0x1ca   :  { %v338_v43 = vadd.f32 0.5, %v337_v42 }
 0x1cc   :  { %339 = vst [vmem:[#allocation10] sm:$0xff] %v338_v43 }
 0x1cd   :  { %350 = dma.vmem_to_hbm [thread:$0]  %s346_s25, 128, %s348_s4, [#allocation4]  }
 0x1ce   :  { %617 = dma.done.wait [#allocation4], 128  }
 0x1cf   :  { %618 = vsyncadd [#allocation4], 4294967168 }
 0x1d0   :  { %355 = vsyncpa [#allocation3], 1 }
 0x1d1   :  { %356 = vsyncpa [#allocation6], 1 }
 0x1d2   :  { %357 = vsyncpa [#allocation9], 1 }
 0x1d3   :  { %358 = vsyncpa [#allocation4], 1 }

</bundles_post_ra>
